<compile_context>
chip_gen: v6e
topology: v6e:2x2x1
jax: 0.10.0
libtpu: 0.0.40
codegen_flags: <defaults>
</compile_context>

<pallas_src>
import jax
import jax.numpy as jnp
from jax.experimental import pallas as pl
from jax.experimental.pallas import tpu as pltpu


def _leaky_relu(x, slope=0.01):
    # LeakyReLU(negative_slope=0.01) == max(x, 0.01*x) for 0 < slope < 1.
    return jnp.maximum(x, slope * x)


def qtable_kernel(x_ref, w1_ref, b1_ref, w2_ref, b2_ref, wq_ref, bq_ref, q_ref):
    x = x_ref[...]                                                     # (TB, 12)

    # dnn: Linear(12, 64) -> LeakyReLU -> Linear(64, 32) -> LeakyReLU
    h1 = _leaky_relu(
        jnp.dot(x, w1_ref[...], preferred_element_type=jnp.float32) + b1_ref[...])
    h2 = _leaky_relu(
        jnp.dot(h1, w2_ref[...], preferred_element_type=jnp.float32) + b2_ref[...])

    # Folded dueling head: value_net + (advantage_net - mean) == one Linear(32, 2).
    q_ref[...] = (jnp.dot(h2, wq_ref[...], preferred_element_type=jnp.float32)
                  + bq_ref[...]).astype(q_ref.dtype)                   # (TB, 2)


def fold_dueling_head(params):
    """Exact fold of value/advantage/mean into a single Linear(32, 2).

    q = v @ [1, 1] + a @ M with M = I - 0.5*ones(2, 2)
      = h2 @ (wv @ [1,1] + wa @ M) + (bv @ [1,1] + ba @ M)
    """
    ones = jnp.ones((1, 2), jnp.float32)
    m = jnp.eye(2, dtype=jnp.float32) - 0.5
    wq = params["wv"] @ ones + params["wa"] @ m                        # (32, 2)
    bq = params["bv"] @ ones + params["ba"] @ m                        # (1, 2)
    return dict(w1=params["w1"], b1=params["b1"],
                w2=params["w2"], b2=params["b2"], wq=wq, bq=bq)


def _round_up(x, m):
    return (x + m - 1) // m * m


def qtable_forward(state, folded, *, tb=512):
    """state: (B, 12) f32; folded: dict from fold_dueling_head()."""
    B, F = state.shape
    # Tile the batch: multiple of 8 sublanes, capped so state+output double
    # buffers stay tiny even against v7x's 64 MiB (32 MiB scoped) VMEM.
    TB = min(tb, _round_up(B, 8))
    pB = _round_up(B, TB)
    if pB != B:
        state = jnp.pad(state, ((0, pB - B), (0, 0)))

    w1, b1, w2, b2, wq, bq = (folded[k] for k in ("w1", "b1", "w2", "b2", "wq", "bq"))

    batch_map = lambda i: (i, 0)      # tile moves along batch
    resident_map = lambda i: (0, 0)   # weights/biases stay VMEM-resident

    out = pl.pallas_call(
        qtable_kernel,
        out_shape=jax.ShapeDtypeStruct((pB, 2), jnp.float32),
        grid_spec=pltpu.PrefetchScalarGridSpec(
            num_scalar_prefetch=0,
            grid=(pB // TB,),
            in_specs=[
                pl.BlockSpec((TB, F), batch_map),
                pl.BlockSpec(w1.shape, resident_map),
                pl.BlockSpec(b1.shape, resident_map),
                pl.BlockSpec(w2.shape, resident_map),
                pl.BlockSpec(b2.shape, resident_map),
                pl.BlockSpec(wq.shape, resident_map),
                pl.BlockSpec(bq.shape, resident_map),
            ],
            out_specs=pl.BlockSpec((TB, 2), batch_map),
        ),
        compiler_params=pltpu.CompilerParams(
            dimension_semantics=("parallel",)),   # uses both TCs on v7x
    )(state, w1, b1, w2, b2, wq, bq)
    return out[:B]


def init_params(key):
    """Deterministic synthetic parameters matching the PyTorch module shapes.

    PyTorch Linear stores weight as (out, in); here we keep the transposed
    (in, out) layout so the kernel does x @ W. Biases kept 2-D (1, out) so
    they broadcast cleanly on TPU.
    """
    ks = jax.random.split(key, 8)

    def lin(kw, kb, fin, fout):
        scale = 1.0 / jnp.sqrt(fin)
        w = jax.random.uniform(kw, (fin, fout), jnp.float32, -scale, scale)
        b = jax.random.uniform(kb, (1, fout), jnp.float32, -scale, scale)
        return w, b

    w1, b1 = lin(ks[0], ks[1], 12, 64)
    w2, b2 = lin(ks[2], ks[3], 64, 32)
    wv, bv = lin(ks[4], ks[5], 32, 1)
    wa, ba = lin(ks[6], ks[7], 32, 2)
    return dict(w1=w1, b1=b1, w2=w2, b2=b2, wv=wv, bv=bv, wa=wa, ba=ba)


def reference_forward(state, p):
    """Pure-JAX reference matching the PyTorch forward (unfolded head)."""
    h1 = _leaky_relu(state @ p["w1"] + p["b1"])
    h2 = _leaky_relu(h1 @ p["w2"] + p["b2"])
    v = h2 @ p["wv"] + p["bv"]
    a = h2 @ p["wa"] + p["ba"]
    return v + (a - a.mean(axis=1, keepdims=True))


if __name__ == "__main__":
    key = jax.random.PRNGKey(0)
    k_params, k_state = jax.random.split(key)

    params = init_params(k_params)
    folded = fold_dueling_head(params)
    state = jax.random.normal(k_state, (8, 12), jnp.float32)  # batch=8, features=12

    q = qtable_forward(state, folded)
    q = jax.block_until_ready(q)

    q_ref = reference_forward(state, params)
    assert q.shape == (8, 2)
    # Folding the head reorders float ops; tolerance stays tight in f32.
    assert jnp.allclose(q, q_ref, atol=2e-5, rtol=1e-5)

    print("KERNEL_OK")
</pallas_src>

<mosaic_0001>
module attributes {stable_mosaic.version = 11 : i64} {
  func.func @qtable_kernel(%arg0: i32, %arg1: memref<8x12xf32, #tpu.memory_space<vmem>>, %arg2: memref<12x64xf32, #tpu.memory_space<vmem>>, %arg3: memref<1x64xf32, #tpu.memory_space<vmem>>, %arg4: memref<64x32xf32, #tpu.memory_space<vmem>>, %arg5: memref<1x32xf32, #tpu.memory_space<vmem>>, %arg6: memref<32x2xf32, #tpu.memory_space<vmem>>, %arg7: memref<1x2xf32, #tpu.memory_space<vmem>>, %arg8: memref<8x2xf32, #tpu.memory_space<vmem>>) attributes {dimension_semantics = [#tpu.dimension_semantics<parallel>], iteration_bounds = array<i64: 1>, scalar_prefetch = 0 : i64, scratch_operands = 0 : i64, tpu.core_type = #tpu.core_type<tc>, window_params = [{transform_indices = @transform_0, window_bounds = array<i64: 8, 12>}, {pipeline_mode = #tpu.pipeline_mode<synchronous>, transform_indices = @transform_1, window_bounds = array<i64: 12, 64>}, {pipeline_mode = #tpu.pipeline_mode<synchronous>, transform_indices = @transform_2, window_bounds = array<i64: 1, 64>}, {pipeline_mode = #tpu.pipeline_mode<synchronous>, transform_indices = @transform_3, window_bounds = array<i64: 64, 32>}, {pipeline_mode = #tpu.pipeline_mode<synchronous>, transform_indices = @transform_4, window_bounds = array<i64: 1, 32>}, {pipeline_mode = #tpu.pipeline_mode<synchronous>, transform_indices = @transform_5, window_bounds = array<i64: 32, 2>}, {pipeline_mode = #tpu.pipeline_mode<synchronous>, transform_indices = @transform_6, window_bounds = array<i64: 1, 2>}, {transform_indices = @transform_7, window_bounds = array<i64: 8, 2>}]} {
    %c0 = arith.constant 0 : index
    %c0_0 = arith.constant 0 : index
    %0 = vector.load %arg1[%c0, %c0_0] : memref<8x12xf32, #tpu.memory_space<vmem>>, vector<8x12xf32>
    %c0_1 = arith.constant 0 : index
    %c0_2 = arith.constant 0 : index
    %1 = vector.load %arg2[%c0_1, %c0_2] : memref<12x64xf32, #tpu.memory_space<vmem>>, vector<12x64xf32>
    %cst = arith.constant dense<0.000000e+00> : vector<8x64xf32>
    %2 = tpu.matmul %0, %1, %cst {dimension_numbers = #tpu.dot_dimension_numbers<[1], [0], [0], [1], [0, 0, 1, 1], [], []>} : vector<8x12xf32>, vector<12x64xf32>, vector<8x64xf32> -> vector<8x64xf32>
    %c0_3 = arith.constant 0 : index
    %c0_4 = arith.constant 0 : index
    %3 = vector.load %arg3[%c0_3, %c0_4] : memref<1x64xf32, #tpu.memory_space<vmem>>, vector<1x64xf32>
    %4 = vector.broadcast %3 : vector<1x64xf32> to vector<8x64xf32>
    %5 = arith.addf %2, %4 : vector<8x64xf32>
    %cst_5 = arith.constant 0.00999999977 : f32
    %6 = vector.broadcast %cst_5 : f32 to vector<8x64xf32>
    %7 = arith.mulf %6, %5 : vector<8x64xf32>
    %8 = arith.maximumf %5, %7 : vector<8x64xf32>
    %c0_6 = arith.constant 0 : index
    %c0_7 = arith.constant 0 : index
    %9 = vector.load %arg4[%c0_6, %c0_7] : memref<64x32xf32, #tpu.memory_space<vmem>>, vector<64x32xf32>
    %cst_8 = arith.constant dense<0.000000e+00> : vector<8x32xf32>
    %10 = tpu.matmul %8, %9, %cst_8 {dimension_numbers = #tpu.dot_dimension_numbers<[1], [0], [0], [1], [0, 0, 1, 1], [], []>} : vector<8x64xf32>, vector<64x32xf32>, vector<8x32xf32> -> vector<8x32xf32>
    %c0_9 = arith.constant 0 : index
    %c0_10 = arith.constant 0 : index
    %11 = vector.load %arg5[%c0_9, %c0_10] : memref<1x32xf32, #tpu.memory_space<vmem>>, vector<1x32xf32>
    %12 = vector.broadcast %11 : vector<1x32xf32> to vector<8x32xf32>
    %13 = arith.addf %10, %12 : vector<8x32xf32>
    %cst_11 = arith.constant 0.00999999977 : f32
    %14 = vector.broadcast %cst_11 : f32 to vector<8x32xf32>
    %15 = arith.mulf %14, %13 : vector<8x32xf32>
    %16 = arith.maximumf %13, %15 : vector<8x32xf32>
    %c0_12 = arith.constant 0 : index
    %c0_13 = arith.constant 0 : index
    %17 = vector.load %arg6[%c0_12, %c0_13] : memref<32x2xf32, #tpu.memory_space<vmem>>, vector<32x2xf32>
    %cst_14 = arith.constant dense<0.000000e+00> : vector<8x2xf32>
    %18 = tpu.matmul %16, %17, %cst_14 {dimension_numbers = #tpu.dot_dimension_numbers<[1], [0], [0], [1], [0, 0, 1, 1], [], []>} : vector<8x32xf32>, vector<32x2xf32>, vector<8x2xf32> -> vector<8x2xf32>
    %c0_15 = arith.constant 0 : index
    %c0_16 = arith.constant 0 : index
    %19 = vector.load %arg7[%c0_15, %c0_16] : memref<1x2xf32, #tpu.memory_space<vmem>>, vector<1x2xf32>
    %20 = vector.broadcast %19 : vector<1x2xf32> to vector<8x2xf32>
    %21 = arith.addf %18, %20 : vector<8x2xf32>
    %c0_17 = arith.constant 0 : index
    %c0_18 = arith.constant 0 : index
    %22 = vector.load %arg8[%c0_17, %c0_18] : memref<8x2xf32, #tpu.memory_space<vmem>>, vector<8x2xf32>
    tpu.vector_store %arg8[%c0_17, %c0_18], %21 {strides = array<i32>} : memref<8x2xf32, #tpu.memory_space<vmem>>, vector<8x2xf32>,
    return
  }
  func.func @transform_0(%arg0: i32) -> (i32, i32) {
    %c0_i32 = arith.constant 0 : i32
    %c0_i32_0 = arith.constant 0 : i32
    return %arg0, %c0_i32 : i32, i32
  }
  func.func @transform_1(%arg0: i32) -> (i32, i32) {
    %c0_i32 = arith.constant 0 : i32
    %c0_i32_0 = arith.constant 0 : i32
    %c0_i32_1 = arith.constant 0 : i32
    return %c0_i32, %c0_i32_0 : i32, i32
  }
  func.func @transform_2(%arg0: i32) -> (i32, i32) {
    %c0_i32 = arith.constant 0 : i32
    %c0_i32_0 = arith.constant 0 : i32
    %c0_i32_1 = arith.constant 0 : i32
    return %c0_i32, %c0_i32_0 : i32, i32
  }
  func.func @transform_3(%arg0: i32) -> (i32, i32) {
    %c0_i32 = arith.constant 0 : i32
    %c0_i32_0 = arith.constant 0 : i32
    %c0_i32_1 = arith.constant 0 : i32
    return %c0_i32, %c0_i32_0 : i32, i32
  }
  func.func @transform_4(%arg0: i32) -> (i32, i32) {
    %c0_i32 = arith.constant 0 : i32
    %c0_i32_0 = arith.constant 0 : i32
    %c0_i32_1 = arith.constant 0 : i32
    return %c0_i32, %c0_i32_0 : i32, i32
  }
  func.func @transform_5(%arg0: i32) -> (i32, i32) {
    %c0_i32 = arith.constant 0 : i32
    %c0_i32_0 = arith.constant 0 : i32
    %c0_i32_1 = arith.constant 0 : i32
    return %c0_i32, %c0_i32_0 : i32, i32
  }
  func.func @transform_6(%arg0: i32) -> (i32, i32) {
    %c0_i32 = arith.constant 0 : i32
    %c0_i32_0 = arith.constant 0 : i32
    %c0_i32_1 = arith.constant 0 : i32
    return %c0_i32, %c0_i32_0 : i32, i32
  }
  func.func @transform_7(%arg0: i32) -> (i32, i32) {
    %c0_i32 = arith.constant 0 : i32
    %c0_i32_0 = arith.constant 0 : i32
    return %arg0, %c0_i32 : i32, i32
  }
}

</mosaic_0001>

<bundles_post_ra>
// kernel: tpu_custom_call.1
= control target key start
LH: loop header
LB: loop body
LE: loop exit
PB: predicated region body
PF: predicated region fallthrough
CT: control target
= control target key end

     0   :  { %vm40_vm0 = vcmask 1043456   ;;  %v361_v0 = vmov 0.0   ;;  %vm362_vm1 = vmmov 0   ;;  %vm36_vm2 = vcmask 97280   ;;  %s463_s1 = inlined_call_operand.vmem [shape: f32[12,64], index: 1, kind: input, shape index: {}]   ;;  %s464_s0 = inlined_call_operand.vmem [shape: f32[8,12], index: 0, kind: input, shape index: {}]   ;;  %s465_s3 = inlined_call_operand.vmem [shape: f32[64,32], index: 3, kind: input, shape index: {}]   ;;  %s466_s2 = inlined_call_operand.vmem [shape: f32[1,64], index: 2, kind: input, shape index: {}]   ;;  %s467_s5 = inlined_call_operand.vmem [shape: f32[32,2], index: 5, kind: input, shape index: {}]   ;;  %s468_s4 = inlined_call_operand.vmem [shape: f32[1,32], index: 4, kind: input, shape index: {}]   ;;  %s469_s6 = inlined_call_operand.vmem [shape: f32[1,2], index: 6, kind: input, shape index: {}]   ;;  %s470_s7 = inlined_call_operand.vmem [shape: f32[8,2], index: 7, kind: output, shape index: {}]  }
   0x1   :  { %322 = vmatprep.subr.mxu0 %v361_v0  ;;  %v28_v1 = vld [vmem:[%s463_s1 + $0x8] sm:$0xf]  ;;  %v27_v2 = vld [vmem:[%s463_s1] sm:$0xff]  ;;  %326 = vmatprep.mubr.msk.f32.mxu0 %vm362_vm1, %v361_v0  ;;  %v123_v4 = vld [vmem:[%s465_s3 + $0x38] sm:$0xff]  ;;  %vm131_vm3 = vcmask 523264   ;;  %vm218_vm4 = vcmask 261120  }
   0x2   :  { %323 = vmatpush3.msk.msra.mxu0 %vm40_vm0, %v28_v1  ;;  %v26_v3 = vld [vmem:[%s464_s0] sm:$0xff]  ;;  %329 = vmatprep.subr.mxu1 %v361_v0  ;;  %v122_v5 = vld [vmem:[%s465_s3 + $0x30] sm:$0xff]  ;;  %v121_v6 = vld [vmem:[%s465_s3 + $0x28] sm:$0xff]  ;;  %vm292_vm5 = vcmask 15360  }
   0x3   :  { %324 = vmatprep.subr.mxu0 %v361_v0  ;;  %330 = vmatpush3.msra.mxu1 %v123_v4  ;;  %v120_v7 = vld [vmem:[%s465_s3 + $0x20] sm:$0xff]  ;;  %v119_v8 = vld [vmem:[%s465_s3 + $0x18] sm:$0xff]  ;;  %v118_v9 = vld [vmem:[%s465_s3 + $0x10] sm:$0xff] }
   0x4   :  { %325 = vmatpush3.msra.mxu0 %v27_v2  ;;  %331 = vmatprep.subr.mxu1 %v361_v0  ;;  %v117_v10 = vld [vmem:[%s465_s3 + $0x8] sm:$0xff]  ;;  %v116_v11 = vld [vmem:[%s465_s3] sm:$0xff]  ;;  %v210_v18 = vld [vmem:[%s467_s5 + $0x18] sm:$0xff] }
   0x5   :  { %327 = vmatmul.mubr.msk.f32.vlgmr.msra.gmra.mxu0 %vm36_vm2, %v26_v3  ;;  %332 = vmatpush3.msra.mxu1 %v122_v5  ;;  %v298_v12 = vld [vmem:[%s466_s2] ss:$0 sm:$0xff]  ;;  %v209_v19 = vld [vmem:[%s467_s5 + $0x10] sm:$0xff]  ;;  %v208_v20 = vld [vmem:[%s467_s5 + $0x8] sm:$0xff] }
   0x6   :  { %333 = vmatprep.subr.mxu1 %v361_v0  ;;  %345 = vmatprep.mubr.msk.f32.mxu1 %vm362_vm1, %v361_v0  ;;  %v207_v21 = vld [vmem:[%s467_s5] sm:$0xff] }
   0x7   :  { %334 = vmatpush3.msra.mxu1 %v121_v6  ;;  %348 = vmatprep.subr.mxu0 %v361_v0  ;;  %v301_v22 = vld [vmem:[%s468_s4] ss:$0 sm:$0xff] }
   0x8   :  { %335 = vmatprep.subr.mxu1 %v361_v0  ;;  %356 = vmatprep.mubr.msk.f32.mxu0 %vm362_vm1, %v361_v0  ;;  %v303_v28 = vld [vmem:[%s469_s6] ss:$0 sm:$0xff] }
   0x9   :  { %336 = vmatpush3.msra.mxu1 %v120_v7  ;;  %349 = vmatpush3.msra.mxu0 %v210_v18 }
   0xa   :  { %337 = vmatprep.subr.mxu1 %v361_v0  ;;  %350 = vmatprep.subr.mxu0 %v361_v0 }
   0xb   :  { %338 = vmatpush3.msra.mxu1 %v119_v8  ;;  %351 = vmatpush3.msra.mxu0 %v209_v19 }
   0xc   :  { %339 = vmatprep.subr.mxu1 %v361_v0  ;;  %352 = vmatprep.subr.mxu0 %v361_v0 }
   0xd   :  { %340 = vmatpush3.msra.mxu1 %v118_v9  ;;  %353 = vmatpush3.msra.mxu0 %v208_v20 }
   0xe   :  { %341 = vmatprep.subr.mxu1 %v361_v0  ;;  %354 = vmatprep.subr.mxu0 %v361_v0 }
   0xf   :  { %342 = vmatpush3.msra.mxu1 %v117_v10  ;;  %355 = vmatpush3.msra.mxu0 %v207_v21 }
  0x10   :  { %343 = vmatprep.subr.mxu1 %v361_v0 }
  0x11   :  { %344 = vmatpush3.msra.mxu1 %v116_v11 }
  0xc5   :  { %v110_v13 = vpop.f32.mrf.mxu0 }
  0xc6   :  { %v111_v14 = vadd.f32 %v298_v12, %v110_v13 }
  0xc7   :  { %v328_v15 = vpop.f32.mrf.mxu0 }
  0xc8   :  { %v114_v16 = vmul.f32 0.01, %v111_v14 }
  0xca   :  { %v115_v17 = vmax.f32 %v111_v14, %v114_v16 }
  0xcc   :  { %346 = vmatmul.mubr.msk.f32.vlgmr.msra.gmra.mxu1 %vm131_vm3, %v115_v17 }
 0x18c   :  { %v201_v23 = vpop.f32.mrf.mxu1 }
 0x18d   :  { %v202_v24 = vadd.f32 %v301_v22, %v201_v23 }
 0x18e   :  { %v347_v25 = vpop.f32.mrf.mxu1 }
 0x18f   :  { %v205_v26 = vmul.f32 0.01, %v202_v24 }
 0x191   :  { %v206_v27 = vmax.f32 %v202_v24, %v205_v26 }
 0x193   :  { %357 = vmatmul.mubr.msk.f32.vlgmr.msra.gmra.mxu0 %vm218_vm4, %v206_v27 }
 0x253   :  { %v288_v29 = vpop.f32.mrf.mxu0 }
 0x254   :  { %v289_v30 = vadd.f32 %v303_v28, %v288_v29 }
 0x255   :  { %v358_v31 = vpop.f32.mrf.mxu0 }
 0x256   :  { %293 = vst.msk [vmem:[%s470_s7] sm:$0xff] %vm292_vm5, %v289_v30 }

</bundles_post_ra>
